<compile_context>
chip_gen: v7x
topology: tpu7x:2x2x1
jax: 0.10.0
libtpu: 0.0.40
codegen_flags: <defaults>
</compile_context>

<pallas_src>
import functools

import jax
import jax.numpy as jnp
from jax.experimental import pallas as pl
from jax.experimental.pallas import tpu as pltpu


# ----------------------------- Pallas kernel -------------------------------

def _criterion_kernel(logits_ref, labels_ref, boxes_ref, out_ref, *,
                      num_classes, eos_coef):
    logits = logits_ref[...].astype(jnp.float32)             # [tb, Q, C1]
    labels = labels_ref[...][:, 0, :]                        # [tb, Q] int32
    tb, Q, C1 = logits.shape

    # ---- weighted cross-entropy: per-image weighted mean, summed over images ----
    m = jnp.max(logits, axis=-1, keepdims=True)              # [tb, Q, 1]
    z = logits - m                                            # [tb, Q, C1]
    lse = jnp.log(jnp.sum(jnp.exp(z), axis=-1))               # [tb, Q]
    # gather z at the target label without materializing a full one-hot:
    cls = jax.lax.broadcasted_iota(jnp.int32, (1, 1, C1), 2)  # lane-only iota
    z_at = jnp.sum(jnp.where(cls == labels[:, :, None], z, 0.0), axis=-1)  # [tb, Q]
    nll = lse - z_at                                          # [tb, Q]
    # background_weight is ones except eos_coef at index num_classes:
    smpw = jnp.where(labels == num_classes, eos_coef, 1.0)    # [tb, Q]
    num_b = jnp.sum(smpw * nll, axis=1, keepdims=True)        # [tb, 1]
    den_b = jnp.sum(smpw, axis=1, keepdims=True)              # [tb, 1]
    ce = jnp.sum(num_b / den_b, axis=0, keepdims=True)        # [1, 1]

    # ---- boxes: [tb, 8, M] = 4 pred (cxcywh) + 4 target (raw xyxy) sublanes ----
    bx = boxes_ref[...]                                       # [tb, 8, M] f32
    pcx, pcy, pw, ph = bx[:, 0, :], bx[:, 1, :], bx[:, 2, :], bx[:, 3, :]
    t0, t1, t2, t3 = bx[:, 4, :], bx[:, 5, :], bx[:, 6, :], bx[:, 7, :]

    # L1 loss: sum |pred_cxcywh - target_raw| over matched boxes.
    l1 = (jnp.abs(pcx - t0) + jnp.abs(pcy - t1)
          + jnp.abs(pw - t2) + jnp.abs(ph - t3))              # [tb, M]
    l1_sum = jnp.sum(jnp.sum(l1, axis=-1, keepdims=True),
                     axis=0, keepdims=True)                   # [1, 1]

    # GIoU loss: both sides through cxcywh->xyxy (exactly as the reference),
    # element-wise per matched pair == diag of the pairwise GIoU matrix.
    px0 = pcx - pw * 0.5; py0 = pcy - ph * 0.5
    px1 = pcx + pw * 0.5; py1 = pcy + ph * 0.5
    tx0 = t0 - t2 * 0.5;  ty0 = t1 - t3 * 0.5
    tx1 = t0 + t2 * 0.5;  ty1 = t1 + t3 * 0.5

    area_p = (px1 - px0) * (py1 - py0)
    area_t = (tx1 - tx0) * (ty1 - ty0)
    iw = jnp.maximum(jnp.minimum(px1, tx1) - jnp.maximum(px0, tx0), 0.0)
    ih = jnp.maximum(jnp.minimum(py1, ty1) - jnp.maximum(py0, ty0), 0.0)
    inter = iw * ih
    union = area_p + area_t - inter
    iou = inter / union
    cw = jnp.maximum(jnp.maximum(px1, tx1) - jnp.minimum(px0, tx0), 0.0)
    ch = jnp.maximum(jnp.maximum(py1, ty1) - jnp.minimum(py0, ty0), 0.0)
    area_c = cw * ch
    giou = iou - (area_c - union) / area_c
    giou_sum = jnp.sum(jnp.sum(1.0 - giou, axis=-1, keepdims=True),
                       axis=0, keepdims=True)                 # [1, 1]

    # ---- pack the three partial sums into this step's lane-dense output block ----
    # (values replicate down the 8 sublanes; the wrapper reads sublane 0, lanes 0..2)
    lane = jax.lax.broadcasted_iota(jnp.int32, out_ref.shape, 2)   # (1, 8, 128)
    out_ref[...] = (jnp.where(lane == 0, ce, 0.0)
                    + jnp.where(lane == 1, l1_sum, 0.0)
                    + jnp.where(lane == 2, giou_sum, 0.0))


# ------------------------------ JAX wrapper --------------------------------

def _vmem_estimate_bytes(block_b, Q, C1, M, logit_itemsize):
    """Rough per-step VMEM footprint: double-buffered inputs + f32 CE temps."""
    inputs = 2 * (block_b * Q * C1 * logit_itemsize     # logits (double-buffered)
                  + block_b * Q * 4                      # labels (int32)
                  + block_b * 8 * M * 4)                 # packed boxes (f32)
    temps = 3 * block_b * Q * C1 * 4                     # z, exp(z), masked-z (f32)
    return inputs + temps + (1 << 20)                    # + output / misc headroom


def set_criterion_forward(outputs, targets, indices, num_classes,
                          weight_dict, eos_coef=0.1, block_b=None):
    """Reproduces SetCriterion.forward given precomputed matcher indices."""
    pred_labels = outputs['pred_labels']          # [B, Q, C+1], native dtype (bf16 ok)
    pred_boxes = outputs['pred_boxes']            # [B, Q, 4] (cx, cy, w, h)
    B, Q, C1 = pred_labels.shape
    itemsize = jnp.dtype(pred_labels.dtype).itemsize

    # ---- batched matcher-index gathers (no per-image host loop of XLA ops) ----
    # Assumes every image has the same number of matches M (true for the demo).
    pi_all = jnp.stack([jnp.asarray(pi, jnp.int32) for pi, _ in indices])        # [B, M]
    ti_all = jnp.stack([jnp.asarray(ti, jnp.int32) for _, ti in indices])        # [B, M]
    tgt_labels = jnp.stack([jnp.asarray(t['labels'], jnp.int32) for t in targets])
    tgt_boxes = jnp.stack([jnp.asarray(t['boxes'], jnp.float32) for t in targets])
    M = pi_all.shape[1]

    matched_labels = jnp.take_along_axis(tgt_labels, ti_all, axis=1)             # [B, M]
    labels_full = jnp.full((B, Q), num_classes, jnp.int32)
    labels_full = labels_full.at[jnp.arange(B)[:, None], pi_all].set(matched_labels)
    labels_full = labels_full.reshape(B, 1, Q)          # trailing dims (1, Q) block-safe

    pbox_m = jnp.take_along_axis(pred_boxes, pi_all[:, :, None], axis=1)         # [B, M, 4]
    tbox_m = jnp.take_along_axis(tgt_boxes, ti_all[:, :, None], axis=1)          # [B, M, 4]
    # Single packed input: sublanes 0..3 = pred cxcywh, 4..7 = target raw xyxy.
    boxes_packed = jnp.concatenate(
        [jnp.transpose(pbox_m.astype(jnp.float32), (0, 2, 1)),
         jnp.transpose(tbox_m, (0, 2, 1))], axis=1)                              # [B, 8, M]

    # ---- tile sizing: biggest batch tile that fits a conservative VMEM budget ----
    if block_b is None:
        block_b = 1
        for bb in range(1, B + 1):
            if B % bb == 0 and _vmem_estimate_bytes(bb, Q, C1, M, itemsize) <= (20 << 20):
                block_b = bb
    assert B % block_b == 0
    grid_b = B // block_b
    vmem_limit = int(min(max(2 * _vmem_estimate_bytes(block_b, Q, C1, M, itemsize),
                             32 << 20), 48 << 20))

    kernel = functools.partial(_criterion_kernel,
                               num_classes=int(num_classes),
                               eos_coef=float(eos_coef))

    packed = pl.pallas_call(
        kernel,
        out_shape=jax.ShapeDtypeStruct((grid_b, 8, 128), jnp.float32),
        grid=(grid_b,),
        in_specs=[
            pl.BlockSpec((block_b, Q, C1), lambda i: (i, 0, 0)),   # logits, native dtype
            pl.BlockSpec((block_b, 1, Q), lambda i: (i, 0, 0)),    # target labels
            pl.BlockSpec((block_b, 8, M), lambda i: (i, 0, 0)),    # packed pred+target boxes
        ],
        # Per-step partial output: each grid step owns its own (1, 8, 128) block,
        # so the axis is truly "parallel" (both v7x TensorCores usable) and there
        # is no loop-carried output dependency.
        out_specs=pl.BlockSpec((1, 8, 128), lambda i: (i, 0, 0)),
        compiler_params=pltpu.CompilerParams(
            dimension_semantics=("parallel",),
            vmem_limit_bytes=vmem_limit),
    )(pred_labels, labels_full, boxes_packed)

    # Tiny final reduction over grid steps in plain JAX.
    sums = jnp.sum(packed[:, 0, :3], axis=0)            # [3] = (ce, l1, giou)

    num_total_boxes = sum(int(t['boxes'].shape[0]) for t in targets)
    return {
        'loss_ce': sums[0] * weight_dict.get('loss_ce', 1.0) / len(targets),
        'loss_bbox': sums[1] * weight_dict.get('loss_bbox', 1.0) / num_total_boxes,
        'loss_giou': sums[2] * weight_dict.get('loss_giou', 1.0) / num_total_boxes,
    }


# --------------------------- pure-JAX reference ----------------------------

def _reference(outputs, targets, indices, num_classes, weight_dict, eos_coef=0.1):
    pred_labels = outputs['pred_labels']
    pred_boxes = outputs['pred_boxes']
    B, Q, C1 = pred_labels.shape
    w = jnp.ones(C1, jnp.float32).at[-1].set(eos_coef)
    num_total = sum(int(t['boxes'].shape[0]) for t in targets)
    loss_ce = 0.0; loss_bbox = 0.0; loss_giou = 0.0

    def to_xyxy(b):
        cx, cy, ww, hh = b[:, 0], b[:, 1], b[:, 2], b[:, 3]
        return jnp.stack([cx - ww / 2, cy - hh / 2, cx + ww / 2, cy + hh / 2], -1)

    for i, (pi, ti) in enumerate(indices):
        logits = pred_labels[i].astype(jnp.float32)   # same f32 math as the kernel
        tl = jnp.full((Q,), num_classes, jnp.int32).at[pi].set(
            targets[i]['labels'][ti].astype(jnp.int32))
        logp = jax.nn.log_softmax(logits, axis=-1)
        nll = -logp[jnp.arange(Q), tl]
        sw = w[tl]
        loss_ce = loss_ce + jnp.sum(sw * nll) / jnp.sum(sw)

        mpb = pred_boxes[i][pi].astype(jnp.float32)
        mtb = targets[i]['boxes'][ti].astype(jnp.float32)
        loss_bbox = loss_bbox + jnp.sum(jnp.abs(mpb - mtb))

        p = to_xyxy(mpb); t = to_xyxy(mtb)
        area_p = (p[:, 2] - p[:, 0]) * (p[:, 3] - p[:, 1])
        area_t = (t[:, 2] - t[:, 0]) * (t[:, 3] - t[:, 1])
        wh = jnp.maximum(jnp.minimum(p[:, 2:], t[:, 2:]) -
                         jnp.maximum(p[:, :2], t[:, :2]), 0.0)
        inter = wh[:, 0] * wh[:, 1]
        union = area_p + area_t - inter
        iou = inter / union
        whc = jnp.maximum(jnp.maximum(p[:, 2:], t[:, 2:]) -
                          jnp.minimum(p[:, :2], t[:, :2]), 0.0)
        area_c = whc[:, 0] * whc[:, 1]
        giou = iou - (area_c - union) / area_c
        loss_giou = loss_giou + jnp.sum(1.0 - giou)

    return {
        'loss_ce': loss_ce * weight_dict.get('loss_ce', 1.0) / len(targets),
        'loss_bbox': loss_bbox * weight_dict.get('loss_bbox', 1.0) / num_total,
        'loss_giou': loss_giou * weight_dict.get('loss_giou', 1.0) / num_total,
    }


# --------------------------------- main -------------------------------------

if __name__ == "__main__":
    B, Q, num_classes, M = 2, 8, 4, 3
    C1 = num_classes + 1
    eos_coef = 0.1
    weight_dict = {'loss_ce': 1.0, 'loss_bbox': 5.0, 'loss_giou': 2.0}

    key = jax.random.PRNGKey(0)
    k1, k2, k3, k4, k5 = jax.random.split(key, 5)

    outputs = {
        # logits kept in bf16 end-to-end (mixed-precision model output); the
        # kernel upcasts in VMEM, halving the dominant HBM read vs. f32.
        'pred_labels': jax.random.normal(k1, (B, Q, C1), jnp.float32).astype(jnp.bfloat16),
        'pred_boxes': jax.random.uniform(k2, (B, Q, 4), jnp.float32,
                                         minval=0.05, maxval=0.95),
    }
    # Targets: per-image labels and *unnormalized* xyxy boxes with positive extents.
    tmin = jax.random.uniform(k3, (B, M, 2), jnp.float32, minval=0.5, maxval=5.0)
    tmax = jax.random.uniform(k4, (B, M, 2), jnp.float32, minval=6.0, maxval=20.0)
    tlabels = jax.random.randint(k5, (B, M), 0, num_classes)
    targets = [
        {'labels': tlabels[i],
         'boxes': jnp.concatenate([tmin[i], tmax[i]], axis=-1)}
        for i in range(B)
    ]

    # Deterministic synthetic matcher output (Hungarian matcher not translated).
    indices = [
        (jnp.array([0, 2, 5], jnp.int32), jnp.array([1, 0, 2], jnp.int32)),
        (jnp.array([1, 3, 6], jnp.int32), jnp.array([2, 1, 0], jnp.int32)),
    ]

    losses = set_criterion_forward(outputs, targets, indices, num_classes,
                                   weight_dict, eos_coef)
    losses = {k: jax.block_until_ready(v) for k, v in losses.items()}

    ref = _reference(outputs, targets, indices, num_classes, weight_dict, eos_coef)
    # Exact divides in-kernel -> tight parity with the pure-JAX reference.
    for k in losses:
        if not jnp.allclose(losses[k], ref[k], rtol=1e-4, atol=1e-4):
            raise AssertionError(f"mismatch for {k}: {losses[k]} vs {ref[k]}")

    print("KERNEL_OK")
</pallas_src>

<mosaic_0001>
module attributes {stable_mosaic.version = 11 : i64} {
  func.func @_criterion_kernel(%arg0: i32, %arg1: memref<2x8x5xbf16, #tpu.memory_space<vmem>>, %arg2: memref<2x1x8xi32, #tpu.memory_space<vmem>>, %arg3: memref<2x8x3xf32, #tpu.memory_space<vmem>>, %arg4: memref<1x8x128xf32, #tpu.memory_space<vmem>>) attributes {dimension_semantics = [#tpu.dimension_semantics<parallel>], iteration_bounds = array<i64: 1>, scalar_prefetch = 0 : i64, scratch_operands = 0 : i64, tpu.core_type = #tpu.core_type<tc>, window_params = [{transform_indices = @transform_0, window_bounds = array<i64: 2, 8, 5>}, {transform_indices = @transform_1, window_bounds = array<i64: 2, 1, 8>}, {transform_indices = @transform_2, window_bounds = array<i64: 2, 8, 3>}, {transform_indices = @transform_3, window_bounds = array<i64: 1, 8, 128>}]} {
    %c0 = arith.constant 0 : index
    %c0_0 = arith.constant 0 : index
    %c0_1 = arith.constant 0 : index
    %0 = vector.load %arg1[%c0, %c0_0, %c0_1] : memref<2x8x5xbf16, #tpu.memory_space<vmem>>, vector<2x8x5xbf16>
    %1 = arith.extf %0 : vector<2x8x5xbf16> to vector<2x8x5xf32>
    %c0_2 = arith.constant 0 : index
    %c0_3 = arith.constant 0 : index
    %c0_4 = arith.constant 0 : index
    %2 = vector.load %arg2[%c0_2, %c0_3, %c0_4] : memref<2x1x8xi32, #tpu.memory_space<vmem>>, vector<2x1x8xi32>
    %3 = vector.shape_cast %2 : vector<2x1x8xi32> to vector<2x8xi32>
    %cst = arith.constant dense<0xFF800000> : vector<2x8xf32>
    %4 = vector.multi_reduction <maximumf>, %1, %cst [2] : vector<2x8x5xf32> to vector<2x8xf32>
    %5 = vector.shape_cast %4 : vector<2x8xf32> to vector<2x8x1xf32>
    %6 = vector.broadcast %5 : vector<2x8x1xf32> to vector<2x8x5xf32>
    %7 = arith.subf %1, %6 : vector<2x8x5xf32>
    %8 = math.exp %7 : vector<2x8x5xf32>
    %cst_5 = arith.constant dense<0.000000e+00> : vector<2x8xf32>
    %9 = vector.multi_reduction <add>, %8, %cst_5 [2] : vector<2x8x5xf32> to vector<2x8xf32>
    %10 = math.log %9 : vector<2x8xf32>
    %11 = tpu.iota {dimensions = array<i32: 2>} : vector<1x1x5xi32>
    %12 = vector.shape_cast %3 : vector<2x8xi32> to vector<2x8x1xi32>
    %13 = vector.broadcast %11 : vector<1x1x5xi32> to vector<2x8x5xi32>
    %14 = vector.broadcast %12 : vector<2x8x1xi32> to vector<2x8x5xi32>
    %15 = arith.cmpi eq, %13, %14 : vector<2x8x5xi32>
    %cst_6 = arith.constant 0.000000e+00 : f32
    %16 = vector.broadcast %cst_6 : f32 to vector<2x8x5xf32>
    %17 = arith.select %15, %7, %16 : vector<2x8x5xi1>, vector<2x8x5xf32>
    %cst_7 = arith.constant dense<0.000000e+00> : vector<2x8xf32>
    %18 = vector.multi_reduction <add>, %17, %cst_7 [2] : vector<2x8x5xf32> to vector<2x8xf32>
    %19 = arith.subf %10, %18 : vector<2x8xf32>
    %c4_i32 = arith.constant 4 : i32
    %20 = vector.broadcast %c4_i32 : i32 to vector<2x8xi32>
    %21 = arith.cmpi eq, %3, %20 : vector<2x8xi32>
    %cst_8 = arith.constant 1.000000e-01 : f32
    %cst_9 = arith.constant 1.000000e+00 : f32
    %22 = vector.broadcast %cst_8 : f32 to vector<2x8xf32>
    %23 = vector.broadcast %cst_9 : f32 to vector<2x8xf32>
    %24 = arith.select %21, %22, %23 : vector<2x8xi1>, vector<2x8xf32>
    %25 = arith.mulf %24, %19 : vector<2x8xf32>
    %cst_10 = arith.constant dense<0.000000e+00> : vector<2xf32>
    %26 = vector.multi_reduction <add>, %25, %cst_10 [1] : vector<2x8xf32> to vector<2xf32>
    %27 = vector.shape_cast %26 : vector<2xf32> to vector<2x1xf32>
    %cst_11 = arith.constant dense<0.000000e+00> : vector<2xf32>
    %28 = vector.multi_reduction <add>, %24, %cst_11 [1] : vector<2x8xf32> to vector<2xf32>
    %29 = vector.shape_cast %28 : vector<2xf32> to vector<2x1xf32>
    %30 = arith.divf %27, %29 : vector<2x1xf32>
    %cst_12 = arith.constant dense<0.000000e+00> : vector<1xf32>
    %31 = vector.multi_reduction <add>, %30, %cst_12 [0] : vector<2x1xf32> to vector<1xf32>
    %32 = vector.shape_cast %31 : vector<1xf32> to vector<1x1xf32>
    %c0_13 = arith.constant 0 : index
    %c0_14 = arith.constant 0 : index
    %c0_15 = arith.constant 0 : index
    %33 = vector.load %arg3[%c0_13, %c0_14, %c0_15] : memref<2x8x3xf32, #tpu.memory_space<vmem>>, vector<2x8x3xf32>
    %34 = vector.extract_strided_slice %33 {offsets = [0, 0, 0], sizes = [2, 1, 3], strides = [1, 1, 1]} : vector<2x8x3xf32> to vector<2x1x3xf32>
    %35 = vector.shape_cast %34 : vector<2x1x3xf32> to vector<2x3xf32>
    %36 = vector.extract_strided_slice %33 {offsets = [0, 1, 0], sizes = [2, 1, 3], strides = [1, 1, 1]} : vector<2x8x3xf32> to vector<2x1x3xf32>
    %37 = vector.shape_cast %36 : vector<2x1x3xf32> to vector<2x3xf32>
    %38 = vector.extract_strided_slice %33 {offsets = [0, 2, 0], sizes = [2, 1, 3], strides = [1, 1, 1]} : vector<2x8x3xf32> to vector<2x1x3xf32>
    %39 = vector.shape_cast %38 : vector<2x1x3xf32> to vector<2x3xf32>
    %40 = vector.extract_strided_slice %33 {offsets = [0, 3, 0], sizes = [2, 1, 3], strides = [1, 1, 1]} : vector<2x8x3xf32> to vector<2x1x3xf32>
    %41 = vector.shape_cast %40 : vector<2x1x3xf32> to vector<2x3xf32>
    %42 = vector.extract_strided_slice %33 {offsets = [0, 4, 0], sizes = [2, 1, 3], strides = [1, 1, 1]} : vector<2x8x3xf32> to vector<2x1x3xf32>
    %43 = vector.shape_cast %42 : vector<2x1x3xf32> to vector<2x3xf32>
    %44 = vector.extract_strided_slice %33 {offsets = [0, 5, 0], sizes = [2, 1, 3], strides = [1, 1, 1]} : vector<2x8x3xf32> to vector<2x1x3xf32>
    %45 = vector.shape_cast %44 : vector<2x1x3xf32> to vector<2x3xf32>
    %46 = vector.extract_strided_slice %33 {offsets = [0, 6, 0], sizes = [2, 1, 3], strides = [1, 1, 1]} : vector<2x8x3xf32> to vector<2x1x3xf32>
    %47 = vector.shape_cast %46 : vector<2x1x3xf32> to vector<2x3xf32>
    %48 = vector.extract_strided_slice %33 {offsets = [0, 7, 0], sizes = [2, 1, 3], strides = [1, 1, 1]} : vector<2x8x3xf32> to vector<2x1x3xf32>
    %49 = vector.shape_cast %48 : vector<2x1x3xf32> to vector<2x3xf32>
    %50 = arith.subf %35, %43 : vector<2x3xf32>
    %51 = math.absf %50 : vector<2x3xf32>
    %52 = arith.subf %37, %45 : vector<2x3xf32>
    %53 = math.absf %52 : vector<2x3xf32>
    %54 = arith.addf %51, %53 : vector<2x3xf32>
    %55 = arith.subf %39, %47 : vector<2x3xf32>
    %56 = math.absf %55 : vector<2x3xf32>
    %57 = arith.addf %54, %56 : vector<2x3xf32>
    %58 = arith.subf %41, %49 : vector<2x3xf32>
    %59 = math.absf %58 : vector<2x3xf32>
    %60 = arith.addf %57, %59 : vector<2x3xf32>
    %cst_16 = arith.constant dense<0.000000e+00> : vector<2xf32>
    %61 = vector.multi_reduction <add>, %60, %cst_16 [1] : vector<2x3xf32> to vector<2xf32>
    %62 = vector.shape_cast %61 : vector<2xf32> to vector<2x1xf32>
    %cst_17 = arith.constant dense<0.000000e+00> : vector<1xf32>
    %63 = vector.multi_reduction <add>, %62, %cst_17 [0] : vector<2x1xf32> to vector<1xf32>
    %64 = vector.shape_cast %63 : vector<1xf32> to vector<1x1xf32>
    %cst_18 = arith.constant 5.000000e-01 : f32
    %65 = vector.broadcast %cst_18 : f32 to vector<2x3xf32>
    %66 = arith.mulf %39, %65 : vector<2x3xf32>
    %67 = arith.subf %35, %66 : vector<2x3xf32>
    %cst_19 = arith.constant 5.000000e-01 : f32
    %68 = vector.broadcast %cst_19 : f32 to vector<2x3xf32>
    %69 = arith.mulf %41, %68 : vector<2x3xf32>
    %70 = arith.subf %37, %69 : vector<2x3xf32>
    %cst_20 = arith.constant 5.000000e-01 : f32
    %71 = vector.broadcast %cst_20 : f32 to vector<2x3xf32>
    %72 = arith.mulf %39, %71 : vector<2x3xf32>
    %73 = arith.addf %35, %72 : vector<2x3xf32>
    %cst_21 = arith.constant 5.000000e-01 : f32
    %74 = vector.broadcast %cst_21 : f32 to vector<2x3xf32>
    %75 = arith.mulf %41, %74 : vector<2x3xf32>
    %76 = arith.addf %37, %75 : vector<2x3xf32>
    %cst_22 = arith.constant 5.000000e-01 : f32
    %77 = vector.broadcast %cst_22 : f32 to vector<2x3xf32>
    %78 = arith.mulf %47, %77 : vector<2x3xf32>
    %79 = arith.subf %43, %78 : vector<2x3xf32>
    %cst_23 = arith.constant 5.000000e-01 : f32
    %80 = vector.broadcast %cst_23 : f32 to vector<2x3xf32>
    %81 = arith.mulf %49, %80 : vector<2x3xf32>
    %82 = arith.subf %45, %81 : vector<2x3xf32>
    %cst_24 = arith.constant 5.000000e-01 : f32
    %83 = vector.broadcast %cst_24 : f32 to vector<2x3xf32>
    %84 = arith.mulf %47, %83 : vector<2x3xf32>
    %85 = arith.addf %43, %84 : vector<2x3xf32>
    %cst_25 = arith.constant 5.000000e-01 : f32
    %86 = vector.broadcast %cst_25 : f32 to vector<2x3xf32>
    %87 = arith.mulf %49, %86 : vector<2x3xf32>
    %88 = arith.addf %45, %87 : vector<2x3xf32>
    %89 = arith.subf %73, %67 : vector<2x3xf32>
    %90 = arith.subf %76, %70 : vector<2x3xf32>
    %91 = arith.mulf %89, %90 : vector<2x3xf32>
    %92 = arith.subf %85, %79 : vector<2x3xf32>
    %93 = arith.subf %88, %82 : vector<2x3xf32>
    %94 = arith.mulf %92, %93 : vector<2x3xf32>
    %95 = arith.minimumf %73, %85 : vector<2x3xf32>
    %96 = arith.maximumf %67, %79 : vector<2x3xf32>
    %97 = arith.subf %95, %96 : vector<2x3xf32>
    %cst_26 = arith.constant 0.000000e+00 : f32
    %98 = vector.broadcast %cst_26 : f32 to vector<2x3xf32>
    %99 = arith.maximumf %97, %98 : vector<2x3xf32>
    %100 = arith.minimumf %76, %88 : vector<2x3xf32>
    %101 = arith.maximumf %70, %82 : vector<2x3xf32>
    %102 = arith.subf %100, %101 : vector<2x3xf32>
    %cst_27 = arith.constant 0.000000e+00 : f32
    %103 = vector.broadcast %cst_27 : f32 to vector<2x3xf32>
    %104 = arith.maximumf %102, %103 : vector<2x3xf32>
    %105 = arith.mulf %99, %104 : vector<2x3xf32>
    %106 = arith.addf %91, %94 : vector<2x3xf32>
    %107 = arith.subf %106, %105 : vector<2x3xf32>
    %108 = arith.divf %105, %107 : vector<2x3xf32>
    %109 = arith.maximumf %73, %85 : vector<2x3xf32>
    %110 = arith.minimumf %67, %79 : vector<2x3xf32>
    %111 = arith.subf %109, %110 : vector<2x3xf32>
    %cst_28 = arith.constant 0.000000e+00 : f32
    %112 = vector.broadcast %cst_28 : f32 to vector<2x3xf32>
    %113 = arith.maximumf %111, %112 : vector<2x3xf32>
    %114 = arith.maximumf %76, %88 : vector<2x3xf32>
    %115 = arith.minimumf %70, %82 : vector<2x3xf32>
    %116 = arith.subf %114, %115 : vector<2x3xf32>
    %cst_29 = arith.constant 0.000000e+00 : f32
    %117 = vector.broadcast %cst_29 : f32 to vector<2x3xf32>
    %118 = arith.maximumf %116, %117 : vector<2x3xf32>
    %119 = arith.mulf %113, %118 : vector<2x3xf32>
    %120 = arith.subf %119, %107 : vector<2x3xf32>
    %121 = arith.divf %120, %119 : vector<2x3xf32>
    %122 = arith.subf %108, %121 : vector<2x3xf32>
    %cst_30 = arith.constant 1.000000e+00 : f32
    %123 = vector.broadcast %cst_30 : f32 to vector<2x3xf32>
    %124 = arith.subf %123, %122 : vector<2x3xf32>
    %cst_31 = arith.constant dense<0.000000e+00> : vector<2xf32>
    %125 = vector.multi_reduction <add>, %124, %cst_31 [1] : vector<2x3xf32> to vector<2xf32>
    %126 = vector.shape_cast %125 : vector<2xf32> to vector<2x1xf32>
    %cst_32 = arith.constant dense<0.000000e+00> : vector<1xf32>
    %127 = vector.multi_reduction <add>, %126, %cst_32 [0] : vector<2x1xf32> to vector<1xf32>
    %128 = vector.shape_cast %127 : vector<1xf32> to vector<1x1xf32>
    %129 = tpu.iota {dimensions = array<i32: 2>} : vector<1x8x128xi32>
    %c0_i32 = arith.constant 0 : i32
    %130 = vector.broadcast %c0_i32 : i32 to vector<1x8x128xi32>
    %131 = arith.cmpi eq, %129, %130 : vector<1x8x128xi32>
    %cst_33 = arith.constant 0.000000e+00 : f32
    %132 = vector.shape_cast %32 : vector<1x1xf32> to vector<1x1x1xf32>
    %133 = vector.broadcast %132 : vector<1x1x1xf32> to vector<1x8x128xf32>
    %134 = vector.broadcast %cst_33 : f32 to vector<1x8x128xf32>
    %135 = arith.select %131, %133, %134 : vector<1x8x128xi1>, vector<1x8x128xf32>
    %c1_i32 = arith.constant 1 : i32
    %136 = vector.broadcast %c1_i32 : i32 to vector<1x8x128xi32>
    %137 = arith.cmpi eq, %129, %136 : vector<1x8x128xi32>
    %cst_34 = arith.constant 0.000000e+00 : f32
    %138 = vector.shape_cast %64 : vector<1x1xf32> to vector<1x1x1xf32>
    %139 = vector.broadcast %138 : vector<1x1x1xf32> to vector<1x8x128xf32>
    %140 = vector.broadcast %cst_34 : f32 to vector<1x8x128xf32>
    %141 = arith.select %137, %139, %140 : vector<1x8x128xi1>, vector<1x8x128xf32>
    %142 = arith.addf %135, %141 : vector<1x8x128xf32>
    %c2_i32 = arith.constant 2 : i32
    %143 = vector.broadcast %c2_i32 : i32 to vector<1x8x128xi32>
    %144 = arith.cmpi eq, %129, %143 : vector<1x8x128xi32>
    %cst_35 = arith.constant 0.000000e+00 : f32
    %145 = vector.shape_cast %128 : vector<1x1xf32> to vector<1x1x1xf32>
    %146 = vector.broadcast %145 : vector<1x1x1xf32> to vector<1x8x128xf32>
    %147 = vector.broadcast %cst_35 : f32 to vector<1x8x128xf32>
    %148 = arith.select %144, %146, %147 : vector<1x8x128xi1>, vector<1x8x128xf32>
    %149 = arith.addf %142, %148 : vector<1x8x128xf32>
    %c0_36 = arith.constant 0 : index
    %c0_37 = arith.constant 0 : index
    %c0_38 = arith.constant 0 : index
    %150 = vector.load %arg4[%c0_36, %c0_37, %c0_38] : memref<1x8x128xf32, #tpu.memory_space<vmem>>, vector<1x8x128xf32>
    tpu.vector_store %arg4[%c0_36, %c0_37, %c0_38], %149 {strides = array<i32>} : memref<1x8x128xf32, #tpu.memory_space<vmem>>, vector<1x8x128xf32>,
    return
  }
  func.func @transform_0(%arg0: i32) -> (i32, i32, i32) {
    %c0_i32 = arith.constant 0 : i32
    %c0_i32_0 = arith.constant 0 : i32
    %c0_i32_1 = arith.constant 0 : i32
    return %arg0, %c0_i32, %c0_i32_0 : i32, i32, i32
  }
  func.func @transform_1(%arg0: i32) -> (i32, i32, i32) {
    %c0_i32 = arith.constant 0 : i32
    %c0_i32_0 = arith.constant 0 : i32
    %c0_i32_1 = arith.constant 0 : i32
    return %arg0, %c0_i32, %c0_i32_0 : i32, i32, i32
  }
  func.func @transform_2(%arg0: i32) -> (i32, i32, i32) {
    %c0_i32 = arith.constant 0 : i32
    %c0_i32_0 = arith.constant 0 : i32
    %c0_i32_1 = arith.constant 0 : i32
    return %arg0, %c0_i32, %c0_i32_0 : i32, i32, i32
  }
  func.func @transform_3(%arg0: i32) -> (i32, i32, i32) {
    %c0_i32 = arith.constant 0 : i32
    %c0_i32_0 = arith.constant 0 : i32
    %c0_i32_1 = arith.constant 0 : i32
    return %arg0, %c0_i32, %c0_i32_0 : i32, i32, i32
  }
}

</mosaic_0001>

<bundles_post_ra>
// kernel: tpu_custom_call.1
= control target key start
LH: loop header
LB: loop body
LE: loop exit
PB: predicated region body
PF: predicated region fallthrough
CT: control target
= control target key end

     0   :  { %vm21_vm0 = vcmask 39936   ;;  %v44_v1 = vlaneseq  ;;  %s723_s0 = inlined_call_operand.vmem [shape: bf16[2,8,5], index: 0, kind: input, shape index: {}]   ;;  %s724_s1 = inlined_call_operand.vmem [shape: s32[2,1,8], index: 1, kind: input, shape index: {}]   ;;  %s725_s2 = inlined_call_operand.vmem [shape: f32[2,8,3], index: 2, kind: input, shape index: {}]   ;;  %s726_s3 = inlined_call_operand.hbm [shape: f32[1,8,128], index: 3, kind: output, shape index: {}]  }
   0x1   :  { %v517_v0 = vld [vmem:[%s723_s0] sm:$0xff]  }
   0x2   :  { %v518_v2 = vunpack.c.l.bf16 %v517_v0  ;;  %v519_v3 = vunpack.c.h.bf16 %v517_v0  ;;  %v595_v4 = vshrl.u32 %v44_v1, 7 }
   0x3   :  { %8 = vsyncpa [#allocation3], 0  ;;  %v601_v6 = vld [vmem:[%s724_s1] sm:$0x1]  ;;  %v610_v9 = vld [vmem:[%s724_s1 + $0x1] sm:$0x1] }
   0x4   :  { %v22_v5 = vsel %vm21_vm0, %v518_v2, -inf  ;;  %v604_v7 = vsub.s32 0, %v595_v4  ;;  %v25_v8 = vsel %vm21_vm0, %v519_v3, -inf  ;;  %v616_v19 = vand.u32 127, %v44_v1  ;;  %v627_v34 = vld [vmem:[%s725_s2 + $0x8] sm:$0xff]  ;;  %v633_v37 = vld [vmem:[%s725_s2] sm:$0xff] }
   0x5   :  { %23 = vmax.xlane.f32.xlu0 %v22_v5  ;;  %v568_v29 = vmov 0   ;;  %v569_v32 = vmov 1966171168   ;;  %v389_v35 = vmul.f32 0.5, %v627_v34  ;;  %v84_v40 = vsub.s32 1, %v595_v4  ;;  %s571_s2 = smov [#allocation2]  }
   0x6   :  { %v49_v10 = vrot.slane %v601_v6, %v604_v7  ;;  %v56_v11 = vrot.slane %v610_v9, %v604_v7  ;;  %524 = vset.pattern.permute.xlu0 %v568_v29  ;;  %525 = vset.pattern.permute.xlu1 %v568_v29  ;;  %v147_v33 = vunpack.c.l.s4 %v569_v32  ;;  %v88_v41 = vsub.s32 2, %v595_v4  ;;  %s508_s20 = sshll.u32 %s571_s2, 4  ;;  %s509_s20 = int_to_ptr.vmem [resolvable:$true] %s508_s20 }
   0x7   :  { %v388_v42 = vmul.f32 0.5, %v633_v37  ;;  %v393_v43 = vrot.slane %v389_v35, 2  ;;  %v92_v45 = vsub.s32 3, %v595_v4  ;;  %v96_v46 = vsub.s32 4, %v595_v4  ;;  %s544_s21 = scalar_lea.vmem %s509_s20, 128  ;;  %p549_p1 = scmp.lt.s32.totalorder %s509_s20, %s509_s20 }
   0x8   :  { %51 = vbcast.lane.b32.xlu1 %v49_v10, 256  ;;  %v148_v36 = vunpack.c.0.s8 %v147_v33  ;;  %v100_v47 = vsub.s32 5, %v595_v4  ;;  %v104_v48 = vsub.s32 6, %v595_v4  ;;  %v108_v54 = vsub.s32 7, %v595_v4  ;;  %p545_p0 = scmp.ne.s32.totalorder %s509_s20, %s544_s21  ;;  %p550_p2 = scmp.lt.s32.totalorder %s544_s21, %s544_s21 }
   0x9   :  { %26 = vmax.xlane.f32.xlu0 %v25_v8  ;;  %v392_v49 = vrot.slane %v388_v42, 2  ;;  %v643_v50 = vsub.f32 %v627_v34, %v393_v43  ;;  %v646_v51 = vadd.f32 %v393_v43, %v627_v34  ;;  %vm72_vm3 = vcmp.eq.s32.totalorder %v601_v6, 4 }
   0xa   :  { %v649_v52 = vsub.s32 %v148_v36, %v595_v4  ;;  %vm73_vm4 = vcmp.eq.s32.totalorder %v610_v9, 4  ;;  %vm374_vm5 = vcmask 1041409   ;;  %vm377_vm6 = vcmask 17408   ;;  %p551_p3 = por %p550_p2, %p549_p1 }
   0xb   :  { %v653_v56 = vsub.f32 %v633_v37, %v392_v49  ;;  %v398_v57 = vadd.f32 %v392_v49, %v633_v37  ;;  %v413_v58 = vrot.slane %v646_v51, 4  ;;  %v421_v59 = vrot.slane %v643_v50, 4 }
   0xc   :  { %58 = vbcast.lane.b32.xlu1 %v56_v11, 256  ;;  %vm304_vm7 = vcmask 58368   ;;  %vm331_vm8 = vcmask 1041408   ;;  %vm493_vm9 = vcmp.eq.s32.totalorder %v616_v19, 0  ;;  %vm495_vm10 = vcmp.eq.s32.totalorder %v616_v19, 1  ;;  %p552_p4 = pnand %p551_p3, %p545_p0 }
   0xd   :  { %v417_v49 = vmin.f32 %v646_v51, %v413_v58  ;;  %vm498_vm11 = vcmp.eq.s32.totalorder %v616_v19, 2 }
  0x7a   :  { %v52_v18 = vpop.permute.xlu1 %51 }
  0x7b   :  { %vm60_vm1 = vcmp.eq.s32.totalorder %v616_v19, %v52_v18 }
  0x7e   :  { %v59_v21 = vpop.permute.xlu1 %58 }
  0x7f   :  { %vm61_vm2 = vcmp.eq.s32.totalorder %v616_v19, %v59_v21 }
  0x92   :  { %v24_v12 = vpop.xlane.xlu0 %23 }
  0x93   :  { %v28_v13 = vsub.f32 %v518_v2, %v24_v12  ;;  %v401_v12 = vsub.f32 %v646_v51, %v643_v50 }
  0x95   :  { %v30_v14 = vmul.f32 1.442695, %v28_v13  ;;  %v62_v23 = vsel %vm60_vm1, %v28_v13, 0.0 }
  0x96   :  { %v27_v15 = vpop.xlane.xlu0 %26  ;;  %v64_v25 = vsel %vm21_vm0, %v62_v23, 0.0 }
  0x97   :  { %526 = vpow2.f32 %v30_v14  ;;  %v29_v16 = vsub.f32 %v519_v3, %v27_v15  ;;  %v400_v15 = vsub.f32 %v398_v57, %v653_v56 }
  0x99   :  { %v32_v17 = vmul.f32 1.442695, %v29_v16  ;;  %v63_v27 = vsel %vm61_vm2, %v29_v16, 0.0  ;;  %v412_v16 = vrot.slane %v398_v57, 4 }
  0x9a   :  { %v67_v28 = vsel %vm21_vm0, %v63_v27, 0.0 }
  0x9b   :  { %528 = vpow2.f32 %v32_v17 }
  0xa1   :  { %v527_v20 = vpop.eup %526 }
  0xa2   :  { %v34_v22 = vsel %vm21_vm0, %v527_v20, 0.0 }
  0xa3   :  { %35 = vadd.xlane.f32.xlu0 %v34_v22 }
  0xa5   :  { %v529_v24 = vpop.eup %528 }
  0xa6   :  { %v37_v26 = vsel %vm21_vm0, %v529_v24, 0.0 }
  0xa7   :  { %65 = vadd.xlane.f32.xlu0 %v64_v25  ;;  %38 = vadd.xlane.f32.xlu1 %v37_v26 }
  0xab   :  { %68 = vadd.xlane.f32.xlu0 %v67_v28 }
 0x130   :  { %v36_v30 = vpop.xlane.xlu0 %35 }
 0x131   :  { %530 = vlog2.f32 %v36_v30 }
 0x134   :  { %v39_v31 = vpop.xlane.xlu1 %38  ;;  %v66_v39 = vpop.xlane.xlu0 %65 }
 0x135   :  { %532 = vlog2.f32 %v39_v31 }
 0x138   :  { %v69_v0 = vpop.xlane.xlu0 %68 }
 0x13b   :  { %v531_v38 = vpop.eup %530 }
 0x13c   :  { %v41_v44 = vmul.f32 0.6931472, %v531_v38  ;;  %v404_v38 = vrot.slane %v400_v15, 1 }
 0x13e   :  { %v70_v53 = vsub.f32 %v41_v44, %v66_v39 }
 0x13f   :  { %v533_v55 = vpop.eup %532 }
 0x140   :  { %v43_v60 = vmul.f32 0.6931472, %v533_v55  ;;  %v81_v61 = vrot.slane %v70_v53, %v604_v7  ;;  %v85_v62 = vrot.slane %v70_v53, %v84_v40  ;;  %v89_v63 = vrot.slane %v70_v53, %v88_v41 }
 0x141   :  { %v93_v1 = vrot.slane %v70_v53, %v92_v45  ;;  %v97_v2 = vrot.slane %v70_v53, %v96_v46  ;;  %v101_v3 = vrot.slane %v70_v53, %v100_v47  ;;  %v105_v5 = vrot.slane %v70_v53, %v104_v48 }
 0x142   :  { %v71_v8 = vsub.f32 %v43_v60, %v69_v0  ;;  %v109_v10 = vrot.slane %v70_v53, %v108_v54  ;;  %v142_v11 = vcombine.low %v81_v61, %v85_v62  ;;  %v420_v55 = vrot.slane %v653_v56, 4 }
 0x143   :  { %v143_v13 = vcombine.low %v89_v63, %v93_v1  ;;  %v144_v14 = vcombine.low %v97_v2, %v101_v3  ;;  %v425_v60 = vmax.f32 %v643_v50, %v421_v59  ;;  %v452_v63 = vmax.f32 %v398_v57, %v412_v16 }
 0x144   :  { %v145_v17 = vcombine.low %v105_v5, %v109_v10  ;;  %v152_v18 = vrot.slane %v142_v11, %v649_v52  ;;  %v113_v20 = vrot.slane %v71_v8, %v604_v7  ;;  %v117_v21 = vrot.slane %v71_v8, %v84_v40 }
 0x145   :  { %v159_v22 = vrot.slane %v143_v13, %v649_v52  ;;  %v166_v23 = vrot.slane %v144_v14, %v649_v52  ;;  %v121_v24 = vrot.slane %v71_v8, %v88_v41  ;;  %v125_v25 = vrot.slane %v71_v8, %v92_v45 }
 0x146   :  { %v173_v26 = vrot.slane %v145_v17, %v649_v52  ;;  %v129_v27 = vrot.slane %v71_v8, %v96_v46  ;;  %v133_v28 = vrot.slane %v71_v8, %v100_v47  ;;  %v137_v29 = vrot.slane %v71_v8, %v104_v48 }
 0x147   :  { %v174_v30 = vcombine.low %v152_v18, %v159_v22  ;;  %v141_v31 = vrot.slane %v71_v8, %v108_v54  ;;  %v191_v32 = vcombine.low %v113_v20, %v117_v21  ;;  %v192_v33 = vcombine.low %v121_v24, %v125_v25 }
 0x148   :  { %v175_v35 = vcombine.low %v166_v23, %v173_v26  ;;  %v193_v36 = vcombine.low %v129_v27, %v133_v28  ;;  %v405_v7 = vrot.slane %v401_v12, 1  ;;  %v408_v48 = vmul.f32 %v404_v38, %v400_v15 }
 0x149   :  { %v182_v39 = vrot.slane %v174_v30, %v649_v52  ;;  %v194_v40 = vcombine.low %v137_v29, %v141_v31  ;;  %v201_v42 = vrot.slane %v191_v32, %v649_v52  ;;  %v208_v41 = vrot.slane %v192_v33, %v649_v52 }
 0x14a   :  { %v189_v43 = vrot.slane %v175_v35, %v649_v52  ;;  %v215_v44 = vrot.slane %v193_v36, %v649_v52  ;;  %v409_v45 = vmul.f32 %v405_v7, %v401_v12  ;;  %v416_v54 = vmin.f32 %v398_v57, %v412_v16 }
 0x14b   :  { %v222_v46 = vrot.slane %v194_v40, %v649_v52  ;;  %v223_v47 = vcombine.low %v201_v42, %v208_v41  ;;  %v424_v0 = vmax.f32 %v653_v56, %v420_v55  ;;  %v427_v1 = vsub.f32 %v417_v49, %v425_v60 }
 0x14c   :  { %v190_v53 = vcombine.low %v182_v39, %v189_v43  ;;  %v441_v2 = vrot.slane %v409_v45, 4  ;;  %v453_v3 = vmax.f32 %v646_v51, %v413_v58  ;;  %v454_v8 = vmin.f32 %v653_v56, %v420_v55 }
 0x14d   :  { %v224_v61 = vcombine.low %v215_v44, %v222_v46  ;;  %v231_v62 = vrot.slane %v223_v47, %v649_v52  ;;  %v455_v10 = vmin.f32 %v643_v50, %v421_v59  ;;  %v426_v11 = vsub.f32 %v416_v54, %v424_v0 }
 0x14e   :  { %241 = vperm.xlu0 %524, %v190_v53   ;;  %v429_v12 = vmax.f32 %v427_v1, 0.0  ;;  %v440_v13 = vrot.slane %v408_v48, 4  ;;  %v456_v57 = vsub.f32 %v452_v63, %v454_v8  ;;  %v445_v18 = vadd.f32 %v441_v2, %v409_v45 }
 0x14f   :  { %v238_v5 = vrot.slane %v224_v61, %v649_v52  ;;  %v457_v15 = vsub.f32 %v453_v3, %v455_v10  ;;  %v428_v16 = vmax.f32 %v426_v11, 0.0  ;;  %v344_v56 = vrot.slane %v627_v34, 4 }
 0x150   :  { %v433_v17 = vrot.slane %v429_v12, 1  ;;  %v458_v20 = vmax.f32 %v456_v57, 0.0  ;;  %v444_v22 = vadd.f32 %v440_v13, %v408_v48  ;;  %v343_v25 = vrot.slane %v633_v37, 4 }
 0x151   :  { %v239_v14 = vcombine.low %v231_v62, %v238_v5  ;;  %v459_v51 = vmax.f32 %v457_v15, 0.0  ;;  %v432_v58 = vrot.slane %v428_v16, 1  ;;  %v348_v28 = vsub.f32 %v627_v34, %v344_v56 }
 0x152   :  { %v437_v21 = vmul.f32 %v433_v17, %v429_v12  ;;  %v462_v23 = vrot.slane %v458_v20, 1  ;;  %v347_v30 = vsub.f32 %v633_v37, %v343_v25  ;;  %v570_v47 = vmov 1.0  }
 0x153   :  { %244 = vperm.xlu1 %525, %v239_v14   ;;  %v463_v24 = vrot.slane %v459_v51, 1  ;;  %v436_v50 = vmul.f32 %v432_v58, %v428_v16  ;;  %v350_v32 = vand.u32 2147483647, %v348_v28  ;;  %v74_v48 = vsel %vm72_vm3, 0.1, %v570_v47 }
 0x154   :  { %v447_v59 = vsub.f32 %v445_v18, %v437_v21  ;;  %v466_v26 = vmul.f32 %v462_v23, %v458_v20  ;;  %v349_v31 = vand.u32 2147483647, %v347_v30  ;;  %v75_v54 = vsel %vm73_vm4, 0.1, %v570_v47 }
 0x155   :  { %v467_v27 = vmul.f32 %v463_v24, %v459_v51  ;;  %v446_v29 = vsub.f32 %v444_v22, %v436_v50  ;;  %v354_v35 = vrot.slane %v350_v32, 1  ;;  %v360_v36 = vrot.slane %v350_v32, 2 }
 0x156   :  { %534 = vrcp.f32 %v447_v59  ;;  %v353_v33 = vrot.slane %v349_v31, 1  ;;  %v359_v39 = vrot.slane %v349_v31, 2  ;;  %v366_v40 = vrot.slane %v350_v32, 3 }
 0x157   :  { %536 = vrcp.f32 %v466_v26  ;;  %v358_v7 = vadd.f32 %v354_v35, %v350_v32  ;;  %v365_v43 = vrot.slane %v349_v31, 3  ;;  %v469_v37 = vsub.f32 %v467_v27, %v447_v59 }
 0x158   :  { %538 = vrcp.f32 %v467_v27  ;;  %v357_v38 = vadd.f32 %v353_v33, %v349_v31  ;;  %v468_v60 = vsub.f32 %v466_v26, %v446_v29  ;;  %v310_v9 = vcombine.low %v74_v48, %v75_v54 }
 0x159   :  { %540 = vrcp.f32 %v446_v29  ;;  %v364_v41 = vadd.f32 %v360_v36, %v358_v7  ;;  %v248_v15 = vsub.s32 %v616_v19, %v595_v4 }
 0x15a   :  { %v363_v42 = vadd.f32 %v359_v39, %v357_v38  ;;  %v317_v3 = vrot.slane %v310_v9, %v649_v52 }
 0x15b   :  { %v370_v45 = vadd.f32 %v366_v40, %v364_v41 }
 0x15c   :  { %v369_v44 = vadd.f32 %v365_v43, %v363_v42  ;;  %v324_v10 = vrot.slane %v317_v3, %v649_v52 }
 0x15d   :  { %v373_v49 = vrot.slane %v370_v45, 7 }
 0x15e   :  { %v326_v13 = vsel %vm304_vm7, %v324_v10, 0.0 }
 0x15f   :  { %v375_v6 = vsel %vm374_vm5, %v373_v49, %v369_v44 }
 0x160   :  { %v535_v34 = vpop.eup %534  ;;  %v378_v63 = vsel %vm377_vm6, %v375_v6, 0.0 }
 0x161   :  { %v537_v46 = vpop.eup %536  ;;  %v451_v55 = vmul.f32 %v535_v34, %v437_v21 }
 0x162   :  { %v539_v53 = vpop.eup %538  ;;  %v471_v1 = vmul.f32 %v537_v46, %v468_v60 }
 0x163   :  { %v541_v61 = vpop.eup %540  ;;  %v473_v62 = vmul.f32 %v539_v53, %v469_v37 }
 0x164   :  { %v449_v0 = vmul.f32 %v541_v61, %v436_v50 }
 0x165   :  { %v475_v2 = vsub.f32 %v451_v55, %v473_v62 }
 0x166   :  { %v474_v5 = vsub.f32 %v449_v0, %v471_v1 }
 0x167   :  { %v477_v8 = vsub.f32 1.0, %v475_v2 }
 0x168   :  { %v476_v11 = vsub.f32 1.0, %v474_v5 }
 0x169   :  { %v480_v12 = vrot.slane %v477_v8, 7 }
 0x16b   :  { %v481_v14 = vsel %vm374_vm5, %v480_v12, %v476_v11 }
 0x16c   :  { %v483_v57 = vsel %vm377_vm6, %v481_v14, 0.0 }
 0x177   :  { %327 = vadd.xlane.f32.xlu1 %v326_v13 }
 0x17b   :  { %484 = vadd.xlane.f32.xlu1 %v483_v57 }
 0x1cd   :  { %v242_v16 = vpop.permute.xlu0 %241 }
 0x1ce   :  { %v249_v17 = vrot.slane %v242_v16, %v248_v15 }
 0x1d0   :  { %v260_v18 = vrot.slane %v249_v17, %v649_v52 }
 0x1d2   :  { %v245_v20 = vpop.permute.xlu1 %244  ;;  %v267_v58 = vrot.slane %v260_v18, %v649_v52 }
 0x1d3   :  { %v253_v51 = vrot.slane %v245_v20, %v248_v15 }
 0x1d4   :  { %v284_v56 = vmul.f32 %v267_v58, %v74_v48 }
 0x1d5   :  { %v274_v21 = vrot.slane %v253_v51, %v649_v52 }
 0x1d7   :  { %v281_v22 = vrot.slane %v274_v21, %v649_v52 }
 0x1d9   :  { %v285_v23 = vmul.f32 %v281_v22, %v75_v54 }
 0x1db   :  { %v288_v24 = vcombine.low %v284_v56, %v285_v23 }
 0x1dd   :  { %v295_v50 = vrot.slane %v288_v24, %v649_v52 }
 0x1df   :  { %v302_v59 = vrot.slane %v295_v50, %v649_v52 }
 0x1e1   :  { %v305_v4 = vsel %vm304_vm7, %v302_v59, 0.0 }
 0x1e2   :  { %306 = vadd.xlane.f32.xlu0 %v305_v4 }
 0x1e6   :  { %379 = vadd.xlane.f32.xlu0 %v378_v63 }
 0x204   :  { %v328_v25 = vpop.xlane.xlu1 %327 }
 0x205   :  { %542 = vrcp.f32 %v328_v25 }
 0x208   :  { %v485_v26 = vpop.xlane.xlu1 %484 }
 0x209   :  { %v486_v27 = vsel %vm331_vm8, %v485_v26, 0.0 }
 0x20a   :  { %v487_v28 = vrot.slane %v486_v27, 4 }
 0x20c   :  { %v488_v30 = vadd.f32 %v487_v28, %v486_v27 }
 0x20e   :  { %v489_v35 = vrot.slane %v488_v30, 2 }
 0x20f   :  { %v543_v29 = vpop.eup %542 }
 0x210   :  { %v490_v40 = vadd.f32 %v489_v35, %v488_v30 }
 0x212   :  { %v491_v37 = vrot.slane %v490_v40, 1 }
 0x214   :  { %v492_v49 = vadd.f32 %v491_v37, %v490_v40 }
 0x216   :  { %v499_v60 = vsel %vm498_vm11, %v492_v49, 0.0 }
 0x26f   :  { %v307_v31 = vpop.xlane.xlu0 %306 }
 0x270   :  { %v330_v32 = vmul.f32 %v543_v29, %v307_v31 }
 0x272   :  { %v332_v33 = vsel %vm331_vm8, %v330_v32, 0.0 }
 0x273   :  { %v333_v36 = vrot.slane %v332_v33, 4  ;;  %v380_v38 = vpop.xlane.xlu0 %379 }
 0x274   :  { %v381_v7 = vsel %vm331_vm8, %v380_v38, 0.0 }
 0x275   :  { %v334_v52 = vadd.f32 %v333_v36, %v332_v33  ;;  %v382_v39 = vrot.slane %v381_v7, 4 }
 0x277   :  { %v335_v42 = vrot.slane %v334_v52, 2  ;;  %v383_v41 = vadd.f32 %v382_v39, %v381_v7 }
 0x279   :  { %v336_v43 = vadd.f32 %v335_v42, %v334_v52  ;;  %v384_v34 = vrot.slane %v383_v41, 2 }
 0x27b   :  { %v337_v44 = vrot.slane %v336_v43, 1  ;;  %v385_v45 = vadd.f32 %v384_v34, %v383_v41 }
 0x27d   :  { %v386_v46 = vrot.slane %v385_v45, 1  ;;  %v338_v47 = vadd.f32 %v337_v44, %v336_v43 }
 0x27f   :  { %v387_v48 = vadd.f32 %v386_v46, %v385_v45  ;;  %v494_v53 = vsel %vm493_vm9, %v338_v47, 0.0 }
 0x281   :  { %v496_v54 = vsel %vm495_vm10, %v387_v48, 0.0 }
 0x282   :  { %v497_v55 = vadd.f32 %v496_v54, %v494_v53 }
 0x284   :  { %v500_v61 = vadd.f32 %v499_v60, %v497_v55 }
 0x286   :  { %501 = vst [vmem:[#allocation2] sm:$0xff] %v500_v61 }
 0x287   :  { %555 = shalt.err (!%p552_p4)
}
 0x288   :  { %s556_s24 = scalar_lea.hbm %s726_s3, 128 }
 0x289   :  { %p557_p5 = scmp.ne.s32.totalorder %s726_s3, %s556_s24  ;;  %p560_p6 = scmp.lt.u32.totalorder %s556_s24, %s726_s3 }
 0x28b   :  { %p562_p7 = pnand %p560_p6, %p557_p5 }
 0x28d   :  { %565 = shalt.err (!%p562_p7)
}
 0x28e   :  { %511 = dma.vmem_to_hbm [thread:$0]  %s509_s20, 128, %s726_s3, [#allocation3]  }
 0x28f   :  { %566 = dma.done.wait [#allocation3], 128  }
 0x290   :  { %567 = vsyncadd [#allocation3], 4294967168 }
 0x291   :  { %515 = vsyncpa [#allocation3], 1 }

</bundles_post_ra>
